<compile_context>
chip_gen: v7x
topology: tpu7x:2x2x1
jax: 0.10.0
libtpu: 0.0.40
codegen_flags: <defaults>
</compile_context>

<pallas_src>
import functools

import jax
import jax.numpy as jnp
from jax.experimental import pallas as pl
from jax.experimental.pallas import tpu as pltpu


def _round_up(x, m):
    return ((x + m - 1) // m) * m


def _fused_mlp_kernel(x_ref, *refs, n_linear: int):
    """Fused MLP over one batch tile: h = x; repeat (h @ W + b [, ReLU])."""
    o_ref = refs[-1]
    p_refs = refs[:-1]  # (w0, b0, w1, b1, ..., w_{n-1}, b_{n-1})
    h = x_ref[...]
    for i in range(n_linear):
        w = p_refs[2 * i][...]
        b = p_refs[2 * i + 1][...]          # (1, out_pad) -> broadcasts over batch
        h = jnp.dot(h, w, preferred_element_type=jnp.float32) + b
        if i < n_linear - 1:                # hidden layers get ReLU
            h = jnp.maximum(h, 0.0)
    o_ref[...] = h.astype(o_ref.dtype)


def fused_mlp_pallas(x, prepped_params, num_classes):
    """x: (B, 784) f32.  prepped_params: list of (W (in_pad, out_pad), b (1, out_pad))."""
    B, in_dim = x.shape
    out_pad = prepped_params[-1][0].shape[1]

    # Batch tiling: sublane-aligned tile, weight-stationary grid over batch.
    TM = max(8, min(512, _round_up(B, 8)))
    B_pad = _round_up(B, TM)
    if B_pad != B:
        x = jnp.pad(x, ((0, B_pad - B), (0, 0)))

    n_linear = len(prepped_params)
    kernel = functools.partial(_fused_mlp_kernel, n_linear=n_linear)

    in_specs = [pl.BlockSpec((TM, in_dim), lambda i: (i, 0))]
    flat_params = []
    for (w, b2d) in prepped_params:
        # Weights/biases stay resident in VMEM across the whole batch grid.
        in_specs.append(pl.BlockSpec(w.shape, lambda i: (0, 0)))
        in_specs.append(pl.BlockSpec(b2d.shape, lambda i: (0, 0)))
        flat_params += [w, b2d]

    out = pl.pallas_call(
        kernel,
        out_shape=jax.ShapeDtypeStruct((B_pad, out_pad), x.dtype),
        grid=(B_pad // TM,),
        in_specs=in_specs,
        out_specs=pl.BlockSpec((TM, out_pad), lambda i: (i, 0)),
        compiler_params=pltpu.CompilerParams(
            dimension_semantics=("parallel",)),
    )(x, *flat_params)
    return out[:B, :num_classes]


def init_params(key, layers=2, num_classes=10, dtype=jnp.float32):
    """Deterministic init matching PyTorch nn.Linear shapes: W (out, in), b (out,)."""
    dims = [(784, 340)] + [(340, 340)] * (layers - 2) + [(340, num_classes)]
    params = []
    for (fan_in, fan_out) in dims:
        key, kw, kb = jax.random.split(key, 3)
        bound = 1.0 / jnp.sqrt(jnp.asarray(fan_in, dtype))
        w = jax.random.uniform(kw, (fan_out, fan_in), dtype, -bound, bound)
        b = jax.random.uniform(kb, (fan_out,), dtype, -bound, bound)
        params.append((w, b))
    return params


def prepare_params(params):
    """One-time weight prep (outside the forward path):
    transpose to (in, out), zero-pad output feature dims to multiples of 128,
    and zero-pad each layer's input rows to match the previous layer's padded
    output.  Padded lanes carry exact zeros through linear + ReLU."""
    prepped = []
    prev_pad = 0
    for (w, b) in params:
        wt = jnp.asarray(w).T                      # (in, out)
        in_dim, out_dim = wt.shape
        out_pad = _round_up(out_dim, 128)
        wt = jnp.pad(wt, ((0, prev_pad), (0, out_pad - out_dim)))
        b2d = jnp.pad(b, (0, out_pad - out_dim)).reshape(1, out_pad)
        prepped.append((wt, b2d))
        prev_pad = out_pad - out_dim
    return prepped


@functools.partial(jax.jit, static_argnames="num_classes")
def fully_connected_relu_forward(x, prepped_params, num_classes=10):
    """Single fused Pallas kernel for the whole MLP."""
    return fused_mlp_pallas(x, prepped_params, num_classes)


if __name__ == "__main__":
    key = jax.random.PRNGKey(0)
    k_params, k_x = jax.random.split(key)

    layers = 2
    num_classes = 10
    batch = 2

    params = init_params(k_params, layers=layers, num_classes=num_classes)
    prepped = prepare_params(params)
    x = jax.random.normal(k_x, (batch, 784), dtype=jnp.float32)

    out = fully_connected_relu_forward(x, prepped, num_classes=num_classes)
    out = jax.block_until_ready(out)

    # Sanity check against pure-JAX reference (original PyTorch-layout params).
    ref = x
    for (w, b) in params[:-1]:
        ref = jnp.maximum(ref @ w.T + b, 0.0)
    w_out, b_out = params[-1]
    ref = ref @ w_out.T + b_out

    assert out.shape == (batch, num_classes), out.shape
    assert jnp.allclose(out, ref, atol=1e-4, rtol=1e-4)
    print("KERNEL_OK")
</pallas_src>

<mosaic_0001>
module attributes {stable_mosaic.version = 11 : i64} {
  func.func @_fused_mlp_kernel(%arg0: i32, %arg1: memref<8x784xf32, #tpu.memory_space<vmem>>, %arg2: memref<784x384xf32, #tpu.memory_space<vmem>>, %arg3: memref<1x384xf32, #tpu.memory_space<vmem>>, %arg4: memref<384x128xf32, #tpu.memory_space<vmem>>, %arg5: memref<1x128xf32, #tpu.memory_space<vmem>>, %arg6: memref<8x128xf32, #tpu.memory_space<vmem>>) attributes {dimension_semantics = [#tpu.dimension_semantics<parallel>], iteration_bounds = array<i64: 1>, scalar_prefetch = 0 : i64, scratch_operands = 0 : i64, tpu.core_type = #tpu.core_type<tc>, window_params = [{transform_indices = @transform_0, window_bounds = array<i64: 8, 784>}, {pipeline_mode = #tpu.pipeline_mode<synchronous>, transform_indices = @transform_1, window_bounds = array<i64: 784, 384>}, {pipeline_mode = #tpu.pipeline_mode<synchronous>, transform_indices = @transform_2, window_bounds = array<i64: 1, 384>}, {pipeline_mode = #tpu.pipeline_mode<synchronous>, transform_indices = @transform_3, window_bounds = array<i64: 384, 128>}, {pipeline_mode = #tpu.pipeline_mode<synchronous>, transform_indices = @transform_4, window_bounds = array<i64: 1, 128>}, {transform_indices = @transform_5, window_bounds = array<i64: 8, 128>}]} {
    %c0 = arith.constant 0 : index
    %c0_0 = arith.constant 0 : index
    %0 = vector.load %arg1[%c0, %c0_0] : memref<8x784xf32, #tpu.memory_space<vmem>>, vector<8x784xf32>
    %c0_1 = arith.constant 0 : index
    %c0_2 = arith.constant 0 : index
    %1 = vector.load %arg2[%c0_1, %c0_2] : memref<784x384xf32, #tpu.memory_space<vmem>>, vector<784x384xf32>
    %c0_3 = arith.constant 0 : index
    %c0_4 = arith.constant 0 : index
    %2 = vector.load %arg3[%c0_3, %c0_4] : memref<1x384xf32, #tpu.memory_space<vmem>>, vector<1x384xf32>
    %cst = arith.constant dense<0.000000e+00> : vector<8x384xf32>
    %3 = tpu.matmul %0, %1, %cst {dimension_numbers = #tpu.dot_dimension_numbers<[1], [0], [0], [1], [0, 0, 1, 1], [], []>} : vector<8x784xf32>, vector<784x384xf32>, vector<8x384xf32> -> vector<8x384xf32>
    %4 = vector.broadcast %2 : vector<1x384xf32> to vector<8x384xf32>
    %5 = arith.addf %3, %4 : vector<8x384xf32>
    %cst_5 = arith.constant 0.000000e+00 : f32
    %6 = vector.broadcast %cst_5 : f32 to vector<8x384xf32>
    %7 = arith.maximumf %5, %6 : vector<8x384xf32>
    %c0_6 = arith.constant 0 : index
    %c0_7 = arith.constant 0 : index
    %8 = vector.load %arg4[%c0_6, %c0_7] : memref<384x128xf32, #tpu.memory_space<vmem>>, vector<384x128xf32>
    %c0_8 = arith.constant 0 : index
    %c0_9 = arith.constant 0 : index
    %9 = vector.load %arg5[%c0_8, %c0_9] : memref<1x128xf32, #tpu.memory_space<vmem>>, vector<1x128xf32>
    %cst_10 = arith.constant dense<0.000000e+00> : vector<8x128xf32>
    %10 = tpu.matmul %7, %8, %cst_10 {dimension_numbers = #tpu.dot_dimension_numbers<[1], [0], [0], [1], [0, 0, 1, 1], [], []>} : vector<8x384xf32>, vector<384x128xf32>, vector<8x128xf32> -> vector<8x128xf32>
    %11 = vector.broadcast %9 : vector<1x128xf32> to vector<8x128xf32>
    %12 = arith.addf %10, %11 : vector<8x128xf32>
    %c0_11 = arith.constant 0 : index
    %c0_12 = arith.constant 0 : index
    %13 = vector.load %arg6[%c0_11, %c0_12] : memref<8x128xf32, #tpu.memory_space<vmem>>, vector<8x128xf32>
    tpu.vector_store %arg6[%c0_11, %c0_12], %12 {strides = array<i32>} : memref<8x128xf32, #tpu.memory_space<vmem>>, vector<8x128xf32>,
    return
  }
  func.func @transform_0(%arg0: i32) -> (i32, i32) {
    %c0_i32 = arith.constant 0 : i32
    %c0_i32_0 = arith.constant 0 : i32
    return %arg0, %c0_i32 : i32, i32
  }
  func.func @transform_1(%arg0: i32) -> (i32, i32) {
    %c0_i32 = arith.constant 0 : i32
    %c0_i32_0 = arith.constant 0 : i32
    %c0_i32_1 = arith.constant 0 : i32
    return %c0_i32, %c0_i32_0 : i32, i32
  }
  func.func @transform_2(%arg0: i32) -> (i32, i32) {
    %c0_i32 = arith.constant 0 : i32
    %c0_i32_0 = arith.constant 0 : i32
    %c0_i32_1 = arith.constant 0 : i32
    return %c0_i32, %c0_i32_0 : i32, i32
  }
  func.func @transform_3(%arg0: i32) -> (i32, i32) {
    %c0_i32 = arith.constant 0 : i32
    %c0_i32_0 = arith.constant 0 : i32
    %c0_i32_1 = arith.constant 0 : i32
    return %c0_i32, %c0_i32_0 : i32, i32
  }
  func.func @transform_4(%arg0: i32) -> (i32, i32) {
    %c0_i32 = arith.constant 0 : i32
    %c0_i32_0 = arith.constant 0 : i32
    %c0_i32_1 = arith.constant 0 : i32
    return %c0_i32, %c0_i32_0 : i32, i32
  }
  func.func @transform_5(%arg0: i32) -> (i32, i32) {
    %c0_i32 = arith.constant 0 : i32
    %c0_i32_0 = arith.constant 0 : i32
    return %arg0, %c0_i32 : i32, i32
  }
}

</mosaic_0001>

<bundles_post_ra>
// kernel: fully_connected_relu_forward.1
= control target key start
LH: loop header
LB: loop body
LE: loop exit
PB: predicated region body
PF: predicated region fallthrough
CT: control target
= control target key end

     0   :  { %10 = vsyncpa [#allocation3], 0  ;;  %s1984_s0 = inlined_call_operand.vmem [shape: f32[8,784], index: 0, kind: input, shape index: {}]   ;;  %s1985_s1 = inlined_call_operand.hbm [shape: f32[784,384], index: 1, kind: input, shape index: {}]   ;;  %s1986_s2 = inlined_call_operand.hbm [shape: f32[1,384], index: 2, kind: input, shape index: {}]   ;;  %s1987_s3 = inlined_call_operand.hbm [shape: f32[384,128], index: 3, kind: input, shape index: {}]   ;;  %s1988_s4 = inlined_call_operand.hbm [shape: f32[1,128], index: 4, kind: input, shape index: {}]   ;;  %s1989_s5 = inlined_call_operand.vmem [shape: f32[8,128], index: 5, kind: output, shape index: {}]  }
   0x1   :  { %11 = vsyncpa [#allocation5], 0 }
   0x2   :  { %12 = vsyncpa [#allocation8], 0  ;;  %s1832_s18 = smov [#allocation4]   ;;  %s1833_s20 = smov [#allocation2]  }
   0x3   :  { %s33_s19 = sshll.u32 %s1832_s18, 4  ;;  %s20_s21 = sshll.u32 %s1833_s20, 4  ;;  %s34_s19 = int_to_ptr.vmem [resolvable:$true] %s33_s19  ;;  %s1873_s21 = int_to_ptr.vmem [resolvable:$true] %s20_s21 }
   0x4   :  { %s1738_s24 = scalar_lea.hbm %s1986_s2, 48 }
   0x5   :  { %p1739_p0 = scmp.ne.s32.totalorder %s1986_s2, %s1738_s24  ;;  %p1742_p1 = scmp.lt.u32.totalorder %s1738_s24, %s1986_s2 }
   0x7   :  { %p1744_p2 = pnand %p1742_p1, %p1739_p0 }
   0x9   :  { %1747 = shalt.err (!%p1744_p2)
}
   0xa   :  { %s1748_s29 = scalar_lea.vmem %s34_s19, 48  ;;  %s1752_s30 = scalar_lea.vmem %s34_s19, 64 }
   0xb   :  { %p1749_p3 = scmp.ne.s32.totalorder %s34_s19, %s1748_s29  ;;  %p1753_p4 = scmp.lt.s32.totalorder %s34_s19, %s34_s19 }
   0xc   :  { %p1754_p5 = scmp.lt.s32.totalorder %s1752_s30, %s1748_s29 }
   0xe   :  { %p1755_p6 = por %p1754_p5, %p1753_p4 }
  0x10   :  { %p1756_p7 = pnand %p1755_p6, %p1749_p3 }
  0x12   :  { %1759 = shalt.err (!%p1756_p7)
}
  0x13   :  { %36 = dma.hbm_to_vmem [thread:$0]  %s1986_s2, 48, %s34_s19, [#allocation5]  }
  0x14   :  { %s1760_s10 = scalar_lea.hbm %s1985_s1, 37632 }
  0x15   :  { %p1761_p8 = scmp.ne.s32.totalorder %s1985_s1, %s1760_s10  ;;  %p1764_p9 = scmp.lt.u32.totalorder %s1760_s10, %s1985_s1 }
  0x17   :  { %p1766_p10 = pnand %p1764_p9, %p1761_p8 }
  0x19   :  { %1769 = shalt.err (!%p1766_p10)
}
  0x1a   :  { %s1770_s15 = scalar_lea.vmem %s1873_s21, 37632  ;;  %p1775_p12 = scmp.lt.s32.totalorder %s1873_s21, %s1873_s21 }
  0x1b   :  { %p1771_p11 = scmp.ne.s32.totalorder %s1873_s21, %s1770_s15  ;;  %p1776_p13 = scmp.lt.s32.totalorder %s1770_s15, %s1770_s15 }
  0x1d   :  { %p1777_p0 = por %p1776_p13, %p1775_p12 }
  0x1f   :  { %p1778_p1 = pnand %p1777_p0, %p1771_p11 }
  0x21   :  { %1781 = shalt.err (!%p1778_p1)
}
  0x22   :  { %s1834_s2 = smov 384   ;;  %s1835_s16 = smov 24  }
  0x23   :  { %26 = dma.hbm_to_vmem [thread:$0]  %s1985_s1, 37632, %s1873_s21, [#allocation3], %s1834_s2, %s1834_s2, %s1835_s16  }
  0x24   :  { %s1836_s19 = smov [#allocation6]   ;;  %s1782_s24 = scalar_lea.hbm %s1987_s3, 6144 }
  0x25   :  { %s42_s20 = sshll.u32 %s1836_s19, 4  ;;  %p1783_p2 = scmp.ne.s32.totalorder %s1987_s3, %s1782_s24  ;;  %s43_s20 = int_to_ptr.vmem [resolvable:$true] %s42_s20 }
  0x26   :  { %p1786_p3 = scmp.lt.u32.totalorder %s1782_s24, %s1987_s3 }
  0x28   :  { %p1788_p4 = pnand %p1786_p3, %p1783_p2 }
  0x2a   :  { %1791 = shalt.err (!%p1788_p4)
}
  0x2b   :  { %s1792_s29 = scalar_lea.vmem %s43_s20, 6144  ;;  %p1797_p6 = scmp.lt.s32.totalorder %s43_s20, %s43_s20 }
  0x2c   :  { %p1793_p5 = scmp.ne.s32.totalorder %s43_s20, %s1792_s29  ;;  %p1798_p7 = scmp.lt.s32.totalorder %s1792_s29, %s1792_s29 }
  0x2e   :  { %p1799_p8 = por %p1798_p7, %p1797_p6 }
  0x30   :  { %p1800_p9 = pnand %p1799_p8, %p1793_p5 }
  0x32   :  { %1803 = shalt.err (!%p1800_p9)
}
  0x33   :  { %s1837_s1 = smov 128   ;;  %s1838_s21 = smov 8  }
  0x34   :  { %48 = dma.hbm_to_vmem [thread:$0]  %s1987_s3, 6144, %s43_s20, [#allocation5], %s1837_s1, %s1837_s1, %s1838_s21  }
  0x35   :  { %s1839_s7 = smov [#allocation7]   ;;  %s1804_s11 = scalar_lea.hbm %s1988_s4, 16 }
  0x36   :  { %s55_s8 = sshll.u32 %s1839_s7, 4  ;;  %p1805_p10 = scmp.ne.s32.totalorder %s1988_s4, %s1804_s11  ;;  %s56_s8 = int_to_ptr.vmem [resolvable:$true] %s55_s8 }
  0x37   :  { %p1808_p11 = scmp.lt.u32.totalorder %s1804_s11, %s1988_s4 }
  0x39   :  { %p1810_p12 = pnand %p1808_p11, %p1805_p10 }
  0x3b   :  { %1813 = shalt.err (!%p1810_p12)
}
  0x3c   :  { %s1814_s2 = scalar_lea.vmem %s56_s8, 16  ;;  %s1818_s3 = scalar_lea.vmem %s56_s8, 32 }
  0x3d   :  { %p1815_p13 = scmp.ne.s32.totalorder %s56_s8, %s1814_s2  ;;  %p1819_p0 = scmp.lt.s32.totalorder %s56_s8, %s56_s8 }
  0x3e   :  { %p1820_p1 = scmp.lt.s32.totalorder %s1818_s3, %s1814_s2 }
  0x40   :  { %p1821_p2 = por %p1820_p1, %p1819_p0 }
  0x42   :  { %p1822_p3 = pnand %p1821_p2, %p1815_p13 }
  0x44   :  { %1825 = shalt.err (!%p1822_p3)
}
  0x45   :  { %58 = dma.hbm_to_vmem [thread:$0]  %s1988_s4, 16, %s56_s8, [#allocation8]  }
  0x46   :  { %1826 = dma.done.wait [#allocation3], 37632  }
  0x47   :  { %1827 = vsyncadd [#allocation3], 4294929664 }
  0x48   :  { %1828 = dma.done.wait [#allocation5], 6192  }
  0x49   :  { %1829 = vsyncadd [#allocation5], 4294961104 }
  0x4a   :  { %1830 = dma.done.wait [#allocation8], 16  }
  0x4b   :  { %1831 = vsyncadd [#allocation8], 4294967280  ;;  %v1840_v0 = vmov 0.0   ;;  %v79_v1 = vld [vmem:[#allocation2 + $0x8] sm:$0xff]  ;;  %v82_v2 = vld [vmem:[#allocation2 + $0x20] sm:$0xff]  ;;  %vm389_vm0 = vcmask 130048  }
  0x4c   :  { %670 = vmatprep.mubr.f32.mxu1 %v1840_v0  ;;  %v78_v3 = vld [vmem:[#allocation2] sm:$0xff]  ;;  %v1368_v4 = vpack.c.bf16 %v82_v2, %v79_v1  ;;  %v81_v5 = vld [vmem:[#allocation2 + $0x18] sm:$0xff]  ;;  %v88_v7 = vld [vmem:[#allocation2 + $0x50] sm:$0xff]  ;;  %vm1842_vm1 = vmmov 0  }
  0x4d   :  { %v85_v6 = vld [vmem:[#allocation2 + $0x38] sm:$0xff]  ;;  %v1370_v8 = vpack.c.bf16 %v81_v5, %v78_v3  ;;  %v84_v10 = vld [vmem:[#allocation2 + $0x30] sm:$0xff]  ;;  %v87_v11 = vld [vmem:[#allocation2 + $0x48] sm:$0xff] }
  0x4e   :  { %v1372_v9 = vpack.c.bf16 %v88_v7, %v85_v6  ;;  %v91_v12 = vld [vmem:[#allocation2 + $0x68] sm:$0xff]  ;;  %1369 = vmatprep.subr.bf16.mxu0 %v1368_v4  ;;  %v94_v13 = vld [vmem:[#allocation2 + $0x80] sm:$0xff]  ;;  %v1374_v14 = vpack.c.bf16 %v87_v11, %v84_v10  ;;  %v93_v17 = vld [vmem:[#allocation2 + $0x78] sm:$0xff] }
  0x4f   :  { %1371 = vmatpush1.bf16.msra.mxu0 %v1370_v8  ;;  %v1376_v15 = vpack.c.bf16 %v94_v13, %v91_v12  ;;  %v90_v16 = vld [vmem:[#allocation2 + $0x60] sm:$0xff]  ;;  %v97_v18 = vld [vmem:[#allocation2 + $0x98] sm:$0xff]  ;;  %v100_v19 = vld [vmem:[#allocation2 + $0xb0] sm:$0xff] }
  0x50   :  { %1373 = vmatprep.subr.bf16.mxu0 %v1372_v9  ;;  %v1378_v20 = vpack.c.bf16 %v93_v17, %v90_v16  ;;  %v1380_v21 = vpack.c.bf16 %v100_v19, %v97_v18  ;;  %v96_v22 = vld [vmem:[#allocation2 + $0x90] sm:$0xff]  ;;  %v99_v23 = vld [vmem:[#allocation2 + $0xa8] sm:$0xff]  ;;  %v106_v25 = vld [vmem:[#allocation2 + $0xe0] sm:$0xff] }
  0x51   :  { %v103_v24 = vld [vmem:[#allocation2 + $0xc8] sm:$0xff]  ;;  %v1382_v26 = vpack.c.bf16 %v99_v23, %v96_v22  ;;  %v102_v28 = vld [vmem:[#allocation2 + $0xc0] sm:$0xff]  ;;  %v105_v29 = vld [vmem:[#allocation2 + $0xd8] sm:$0xff] }
  0x52   :  { %v1384_v27 = vpack.c.bf16 %v106_v25, %v103_v24  ;;  %v109_v30 = vld [vmem:[#allocation2 + $0xf8] sm:$0xff]  ;;  %v112_v31 = vld [vmem:[#allocation2 + $0x110] sm:$0xff]  ;;  %v1386_v32 = vpack.c.bf16 %v105_v29, %v102_v28  ;;  %v111_v35 = vld [vmem:[#allocation2 + $0x108] sm:$0xff] }
  0x53   :  { %1375 = vmatpush1.bf16.msra.mxu0 %v1374_v14  ;;  %v1388_v33 = vpack.c.bf16 %v112_v31, %v109_v30  ;;  %v108_v34 = vld [vmem:[#allocation2 + $0xf0] sm:$0xff]  ;;  %v115_v36 = vld [vmem:[#allocation2 + $0x128] sm:$0xff]  ;;  %v118_v37 = vld [vmem:[#allocation2 + $0x140] sm:$0xff] }
  0x54   :  { %1377 = vmatprep.subr.bf16.mxu0 %v1376_v15  ;;  %v1390_v38 = vpack.c.bf16 %v111_v35, %v108_v34  ;;  %v114_v39 = vld [vmem:[#allocation2 + $0x120] sm:$0xff]  ;;  %v117_v40 = vld [vmem:[#allocation2 + $0x138] sm:$0xff]  ;;  %v1392_v42 = vpack.c.bf16 %v118_v37, %v115_v36  ;;  %v124_v43 = vld [vmem:[#allocation2 + $0x170] sm:$0xff] }
  0x55   :  { %v121_v41 = vld [vmem:[#allocation2 + $0x158] sm:$0xff]  ;;  %v367_v44 = vld [vmem:[#allocation2 + $0x908] sm:$0xff]  ;;  %v370_v45 = vld [vmem:[#allocation2 + $0x920] sm:$0xff]  ;;  %v1394_v51 = vpack.c.bf16 %v117_v40, %v114_v39 }
  0x56   :  { %v1560_v46 = vpack.c.bf16 %v370_v45, %v367_v44  ;;  %v366_v47 = vld [vmem:[#allocation2 + $0x900] sm:$0xff]  ;;  %v369_v48 = vld [vmem:[#allocation2 + $0x918] sm:$0xff]  ;;  %v72_v49 = vld [vmem:[%s1984_s0 + $0x8] sm:$0xff]  ;;  %v1396_v55 = vpack.c.bf16 %v124_v43, %v121_v41 }
  0x57   :  { %1379 = vmatpush1.bf16.msra.mxu0 %v1378_v20  ;;  %v1562_v50 = vpack.c.bf16 %v369_v48, %v366_v47  ;;  %457 = vmatprep.mubr.f32.mxu0 %v72_v49  ;;  %v120_v52 = vld [vmem:[#allocation2 + $0x150] sm:$0xff]  ;;  %v123_v53 = vld [vmem:[#allocation2 + $0x168] sm:$0xff]  ;;  %v130_v59 = vld [vmem:[#allocation2 + $0x1a0] sm:$0xff] }
  0x58   :  { %1381 = vmatprep.subr.bf16.mxu0 %v1380_v21  ;;  %1561 = vmatprep.subr.bf16.mxu1 %v1560_v46  ;;  %v128_v54 = vld [vmem:[#allocation2 + $0x190] sm:$0xff]  ;;  %v127_v56 = vld [vmem:[#allocation2 + $0x188] sm:$0xff]  ;;  %v134_v1 = vld [vmem:[#allocation2 + $0x1c0] sm:$0xff]  ;;  %v1398_v2 = vpack.c.bf16 %v123_v53, %v120_v52 }
  0x59   :  { %1563 = vmatpush1.bf16.msra.mxu1 %v1562_v50  ;;  %v131_v57 = vld [vmem:[#allocation2 + $0x1a8] sm:$0xff]  ;;  %v80_v58 = vld [vmem:[#allocation2 + $0x10] sm:$0xff]  ;;  %v137_v3 = vld [vmem:[#allocation2 + $0x1d8] sm:$0xff]  ;;  %v1400_v6 = vpack.c.bf16 %v130_v59, %v127_v56 }
  0x5a   :  { %v1564_v60 = vpack.c.bf16 %v131_v57, %v128_v54  ;;  %v1935_v61 = vld [vmem:[%s1984_s0 + $0x30] sm:$0xff]  ;;  %v83_v62 = vld [vmem:[#allocation2 + $0x28] sm:$0xff]  ;;  %v86_v4 = vld [vmem:[#allocation2 + $0x40] sm:$0xff]  ;;  %v1568_v10 = vpack.c.bf16 %v137_v3, %v134_v1 }
  0x5b   :  { %1383 = vmatpush1.bf16.msra.mxu0 %v1382_v26  ;;  %v1566_v63 = vpack.c.bf16 %v83_v62, %v80_v58  ;;  %v89_v5 = vld [vmem:[#allocation2 + $0x58] sm:$0xff]  ;;  %v126_v7 = vld [vmem:[#allocation2 + $0x180] sm:$0xff]  ;;  %v136_v11 = vld [vmem:[#allocation2 + $0x1d0] sm:$0xff] }
  0x5c   :  { %1385 = vmatprep.subr.bf16.mxu0 %v1384_v27  ;;  %1565 = vmatprep.subr.bf16.mxu1 %v1564_v60  ;;  %v129_v8 = vld [vmem:[#allocation2 + $0x198] sm:$0xff]  ;;  %v1570_v12 = vpack.c.bf16 %v89_v5, %v86_v4  ;;  %v140_v13 = vld [vmem:[#allocation2 + $0x1f0] sm:$0xff]  ;;  %v143_v14 = vld [vmem:[#allocation2 + $0x208] sm:$0xff] }
  0x5d   :  { %v133_v9 = vld [vmem:[#allocation2 + $0x1b8] sm:$0xff]  ;;  %1163 = vmatmul.mubr.msk.f32.vlgmr.msra.gmra.mrb[0].mxu1 %vm389_vm0, %v1935_v61  ;;  %v1572_v15 = vpack.c.bf16 %v143_v14, %v140_v13  ;;  %v92_v16 = vld [vmem:[#allocation2 + $0x70] sm:$0xff]  ;;  %v95_v17 = vld [vmem:[#allocation2 + $0x88] sm:$0xff]  ;;  %v1402_v18 = vpack.c.bf16 %v129_v8, %v126_v7 }
  0x5e   :  { %1567 = vmatpush3.bf16.msra.mxu1 %v1566_v63  ;;  %741 = vmatprep.mubr.f32.mxu1 %v72_v49  ;;  %v132_v19 = vld [vmem:[#allocation2 + $0x1b0] sm:$0xff]  ;;  %v1404_v20 = vpack.c.bf16 %v136_v11, %v133_v9  ;;  %v135_v21 = vld [vmem:[#allocation2 + $0x1c8] sm:$0xff]  ;;  %v146_v22 = vld [vmem:[#allocation2 + $0x220] sm:$0xff]  ;;  %v1574_v26 = vpack.c.bf16 %v95_v17, %v92_v16 }
  0x5f   :  { %1387 = vmatpush1.bf16.msra.mxu0 %v1386_v32  ;;  %1569 = vmatprep.subr.bf16.mxu1 %v1568_v10  ;;  %v149_v23 = vld [vmem:[#allocation2 + $0x238] sm:$0xff]  ;;  %v139_v24 = vld [vmem:[#allocation2 + $0x1e8] sm:$0xff]  ;;  %v142_v25 = vld [vmem:[#allocation2 + $0x200] sm:$0xff]  ;;  %v1406_v30 = vpack.c.bf16 %v135_v21, %v132_v19 }
  0x60   :  { %1389 = vmatprep.subr.bf16.mxu0 %v1388_v33  ;;  %v1576_v27 = vpack.c.bf16 %v149_v23, %v146_v22  ;;  %v98_v28 = vld [vmem:[#allocation2 + $0xa0] sm:$0xff]  ;;  %v101_v29 = vld [vmem:[#allocation2 + $0xb8] sm:$0xff]  ;;  %v152_v31 = vld [vmem:[#allocation2 + $0x250] sm:$0xff]  ;;  %v1408_v33 = vpack.c.bf16 %v142_v25, %v139_v24 }
  0x61   :  { %v155_v32 = vld [vmem:[#allocation2 + $0x268] sm:$0xff]  ;;  %v138_v34 = vld [vmem:[#allocation2 + $0x1e0] sm:$0xff]  ;;  %v141_v35 = vld [vmem:[#allocation2 + $0x1f8] sm:$0xff] }
  0x62   :  { %1571 = vmatpush3.bf16.msra.mxu1 %v1570_v12  ;;  %v145_v36 = vld [vmem:[#allocation2 + $0x218] sm:$0xff]  ;;  %v148_v37 = vld [vmem:[#allocation2 + $0x230] sm:$0xff]  ;;  %v1580_v39 = vpack.c.bf16 %v155_v32, %v152_v31  ;;  %v107_v41 = vld [vmem:[#allocation2 + $0xe8] sm:$0xff] }
  0x63   :  { %1391 = vmatpush1.bf16.msra.mxu0 %v1390_v38  ;;  %1573 = vmatprep.subr.bf16.mxu1 %v1572_v15  ;;  %v1578_v38 = vpack.c.bf16 %v101_v29, %v98_v28  ;;  %v104_v40 = vld [vmem:[#allocation2 + $0xd0] sm:$0xff]  ;;  %v158_v43 = vld [vmem:[#allocation2 + $0x280] sm:$0xff]  ;;  %v161_v44 = vld [vmem:[#allocation2 + $0x298] sm:$0xff]  ;;  %v1412_v45 = vpack.c.bf16 %v148_v37, %v145_v36 }
  0x64   :  { %1393 = vmatprep.subr.bf16.mxu0 %v1392_v42  ;;  %v1410_v42 = vpack.c.bf16 %v141_v35, %v138_v34  ;;  %v144_v46 = vld [vmem:[#allocation2 + $0x210] sm:$0xff]  ;;  %v147_v47 = vld [vmem:[#allocation2 + $0x228] sm:$0xff]  ;;  %v154_v49 = vld [vmem:[#allocation2 + $0x260] sm:$0xff]  ;;  %v1582_v50 = vpack.c.bf16 %v107_v41, %v104_v40 }
  0x65   :  { %v151_v48 = vld [vmem:[#allocation2 + $0x248] sm:$0xff]  ;;  %v110_v52 = vld [vmem:[#allocation2 + $0x100] sm:$0xff]  ;;  %v113_v53 = vld [vmem:[#allocation2 + $0x118] sm:$0xff]  ;;  %v1414_v54 = vpack.c.bf16 %v147_v47, %v144_v46 }
  0x66   :  { %1575 = vmatpush3.bf16.msra.mxu1 %v1574_v26  ;;  %v167_v56 = vld [vmem:[#allocation2 + $0x2c8] sm:$0xff]  ;;  %v1416_v57 = vpack.c.bf16 %v154_v49, %v151_v48  ;;  %v150_v58 = vld [vmem:[#allocation2 + $0x240] sm:$0xff]  ;;  %v153_v59 = vld [vmem:[#allocation2 + $0x258] sm:$0xff]  ;;  %v1586_v63 = vpack.c.bf16 %v113_v53, %v110_v52 }
  0x67   :  { %1395 = vmatpush1.bf16.msra.mxu0 %v1394_v51  ;;  %1577 = vmatprep.subr.bf16.mxu1 %v1576_v27  ;;  %v1584_v51 = vpack.c.bf16 %v161_v44, %v158_v43  ;;  %v157_v60 = vld [vmem:[#allocation2 + $0x278] sm:$0xff]  ;;  %v160_v62 = vld [vmem:[#allocation2 + $0x290] sm:$0xff]  ;;  %v119_v3 = vld [vmem:[#allocation2 + $0x148] sm:$0xff]  ;;  %v1418_v4 = vpack.c.bf16 %v153_v59, %v150_v58 }
  0x68   :  { %1397 = vmatprep.subr.bf16.mxu0 %v1396_v55  ;;  %v164_v55 = vld [vmem:[#allocation2 + $0x2b0] sm:$0xff]  ;;  %v170_v5 = vld [vmem:[#allocation2 + $0x2e0] sm:$0xff]  ;;  %v1420_v7 = vpack.c.bf16 %v160_v62, %v157_v60  ;;  %v159_v9 = vld [vmem:[#allocation2 + $0x288] sm:$0xff] }
  0x69   :  { %v1588_v1 = vpack.c.bf16 %v167_v56, %v164_v55  ;;  %v156_v8 = vld [vmem:[#allocation2 + $0x270] sm:$0xff]  ;;  %v163_v10 = vld [vmem:[#allocation2 + $0x2a8] sm:$0xff]  ;;  %v166_v11 = vld [vmem:[#allocation2 + $0x2c0] sm:$0xff] }
  0x6a   :  { %1579 = vmatpush3.bf16.msra.mxu1 %v1578_v38  ;;  %v122_v14 = vld [vmem:[#allocation2 + $0x160] sm:$0xff]  ;;  %v125_v15 = vld [vmem:[#allocation2 + $0x178] sm:$0xff]  ;;  %v1422_v16 = vpack.c.bf16 %v159_v9, %v156_v8  ;;  %v224_v17 = vld [vmem:[#allocation2 + $0x490] sm:$0xff]  ;;  %v1424_v19 = vpack.c.bf16 %v166_v11, %v163_v10 }
  0x6b   :  { %1399 = vmatpush1.bf16.msra.mxu0 %v1398_v2  ;;  %1581 = vmatprep.subr.bf16.mxu1 %v1580_v39  ;;  %v116_v2 = vld [vmem:[#allocation2 + $0x130] sm:$0xff]  ;;  %v165_v21 = vld [vmem:[#allocation2 + $0x2b8] sm:$0xff]  ;;  %v1594_v24 = vpack.c.bf16 %v125_v15, %v122_v14  ;;  %v179_v27 = vld [vmem:[#allocation2 + $0x328] sm:$0xff] }
  0x6c   :  { %1401 = vmatprep.subr.bf16.mxu0 %v1400_v6  ;;  %v173_v6 = vld [vmem:[#allocation2 + $0x2f8] sm:$0xff]  ;;  %v1590_v12 = vpack.c.bf16 %v119_v3, %v116_v2  ;;  %v172_v23 = vld [vmem:[#allocation2 + $0x2f0] sm:$0xff]  ;;  %v230_v29 = vld [vmem:[#allocation2 + $0x4c0] sm:$0xff] }
  0x6d   :  { %v1592_v13 = vpack.c.bf16 %v173_v6, %v170_v5  ;;  %v169_v22 = vld [vmem:[#allocation2 + $0x2d8] sm:$0xff]  ;;  %v176_v26 = vld [vmem:[#allocation2 + $0x310] sm:$0xff]  ;;  %v175_v34 = vld [vmem:[#allocation2 + $0x308] sm:$0xff] }
  0x6e   :  { %1583 = vmatpush3.bf16.msra.mxu1 %v1582_v50  ;;  %v1428_v31 = vpack.c.bf16 %v172_v23, %v169_v22  ;;  %v168_v32 = vld [vmem:[#allocation2 + $0x2d0] sm:$0xff]  ;;  %v178_v35 = vld [vmem:[#allocation2 + $0x320] sm:$0xff]  ;;  %v1598_v36 = vpack.c.bf16 %v179_v27, %v176_v26  ;;  %v185_v39 = vld [vmem:[#allocation2 + $0x358] sm:$0xff] }
  0x6f   :  { %1403 = vmatpush1.bf16.msra.mxu0 %v1402_v18  ;;  %1585 = vmatprep.subr.bf16.mxu1 %v1584_v51  ;;  %v227_v18 = vld [vmem:[#allocation2 + $0x4a8] sm:$0xff]  ;;  %v182_v38 = vld [vmem:[#allocation2 + $0x340] sm:$0xff]  ;;  %v1432_v44 = vpack.c.bf16 %v178_v35, %v175_v34  ;;  %v177_v46 = vld [vmem:[#allocation2 + $0x318] sm:$0xff] }
  0x70   :  { %1405 = vmatprep.subr.bf16.mxu0 %v1404_v20  ;;  %v162_v20 = vld [vmem:[#allocation2 + $0x2a0] sm:$0xff]  ;;  %v1596_v25 = vpack.c.bf16 %v227_v18, %v224_v17  ;;  %v239_v43 = vld [vmem:[#allocation2 + $0x508] sm:$0xff]  ;;  %v181_v47 = vld [vmem:[#allocation2 + $0x338] sm:$0xff]  ;;  %v1602_v49 = vpack.c.bf16 %v185_v39, %v182_v38 }
  0x71   :  { %v1426_v28 = vpack.c.bf16 %v165_v21, %v162_v20  ;;  %v71_v41 = vld [vmem:[%s1984_s0] sm:$0xff]  ;;  %v184_v48 = vld [vmem:[#allocation2 + $0x350] sm:$0xff]  ;;  %v191_v52 = vld [vmem:[#allocation2 + $0x388] sm:$0xff] }
  0x72   :  { %1587 = vmatpush3.bf16.msra.mxu1 %v1586_v63  ;;  %v188_v51 = vld [vmem:[#allocation2 + $0x370] sm:$0xff]  ;;  %v245_v55 = vld [vmem:[#allocation2 + $0x538] sm:$0xff]  ;;  %v1436_v56 = vpack.c.bf16 %v184_v48, %v181_v47  ;;  %v183_v58 = vld [vmem:[#allocation2 + $0x348] sm:$0xff] }
  0x73   :  { %1407 = vmatpush1.bf16.msra.mxu0 %v1406_v30  ;;  %1589 = vmatprep.subr.bf16.mxu1 %v1588_v1  ;;  %v233_v30 = vld [vmem:[#allocation2 + $0x4d8] sm:$0xff]  ;;  %v187_v59 = vld [vmem:[#allocation2 + $0x368] sm:$0xff]  ;;  %v190_v60 = vld [vmem:[#allocation2 + $0x380] sm:$0xff]  ;;  %v1606_v62 = vpack.c.bf16 %v191_v52, %v188_v51 }
  0x74   :  { %1409 = vmatprep.subr.bf16.mxu0 %v1408_v33  ;;  %v171_v33 = vld [vmem:[#allocation2 + $0x2e8] sm:$0xff]  ;;  %v1600_v37 = vpack.c.bf16 %v233_v30, %v230_v29  ;;  %v74_v63 = vld [vmem:[%s1984_s0 + $0x18] sm:$0xff]  ;;  %v194_v2 = vld [vmem:[#allocation2 + $0x3a0] sm:$0xff] }
  0x75   :  { %v1430_v40 = vpack.c.bf16 %v171_v33, %v168_v32  ;;  %v197_v3 = vld [vmem:[#allocation2 + $0x3b8] sm:$0xff]  ;;  %v248_v5 = vld [vmem:[#allocation2 + $0x550] sm:$0xff]  ;;  %v251_v6 = vld [vmem:[#allocation2 + $0x568] sm:$0xff] }
  0x76   :  { %1591 = vmatpush3.bf16.msra.mxu1 %v1590_v12  ;;  %v186_v8 = vld [vmem:[#allocation2 + $0x360] sm:$0xff]  ;;  %v189_v9 = vld [vmem:[#allocation2 + $0x378] sm:$0xff]  ;;  %v196_v11 = vld [vmem:[#allocation2 + $0x3b0] sm:$0xff]  ;;  %v1610_v12 = vpack.c.bf16 %v197_v3, %v194_v2 }
  0x77   :  { %1411 = vmatpush1.bf16.msra.mxu0 %v1410_v42  ;;  %1593 = vmatprep.subr.bf16.mxu1 %v1592_v13  ;;  %v236_v42 = vld [vmem:[#allocation2 + $0x4f0] sm:$0xff]  ;;  %v193_v10 = vld [vmem:[#allocation2 + $0x398] sm:$0xff]  ;;  %v1612_v13 = vpack.c.bf16 %v251_v6, %v248_v5  ;;  %v203_v15 = vld [vmem:[#allocation2 + $0x3e8] sm:$0xff] }
  0x78   :  { %1413 = vmatprep.subr.bf16.mxu0 %v1412_v45  ;;  %v174_v45 = vld [vmem:[#allocation2 + $0x300] sm:$0xff]  ;;  %v1604_v50 = vpack.c.bf16 %v239_v43, %v236_v42  ;;  %v200_v14 = vld [vmem:[#allocation2 + $0x3d0] sm:$0xff]  ;;  %v257_v18 = vld [vmem:[#allocation2 + $0x598] sm:$0xff] }
  0x79   :  { %v1434_v53 = vpack.c.bf16 %v177_v46, %v174_v45  ;;  %v254_v17 = vld [vmem:[#allocation2 + $0x580] sm:$0xff]  ;;  %v192_v20 = vld [vmem:[#allocation2 + $0x390] sm:$0xff]  ;;  %v195_v21 = vld [vmem:[#allocation2 + $0x3a8] sm:$0xff] }
  0x7a   :  { %1595 = vmatpush3.bf16.msra.mxu1 %v1594_v24  ;;  %v199_v22 = vld [vmem:[#allocation2 + $0x3c8] sm:$0xff]  ;;  %v202_v23 = vld [vmem:[#allocation2 + $0x3e0] sm:$0xff]  ;;  %v1614_v24 = vpack.c.bf16 %v203_v15, %v200_v14  ;;  %v209_v27 = vld [vmem:[#allocation2 + $0x418] sm:$0xff] }
  0x7b   :  { %1415 = vmatpush1.bf16.msra.mxu0 %v1414_v54  ;;  %1597 = vmatprep.subr.bf16.mxu1 %v1596_v25  ;;  %v242_v54 = vld [vmem:[#allocation2 + $0x520] sm:$0xff]  ;;  %v1616_v25 = vpack.c.bf16 %v257_v18, %v254_v17  ;;  %v260_v29 = vld [vmem:[#allocation2 + $0x5b0] sm:$0xff]  ;;  %v263_v30 = vld [vmem:[#allocation2 + $0x5c8] sm:$0xff] }
  0x7c   :  { %1417 = vmatprep.subr.bf16.mxu0 %v1416_v57  ;;  %v180_v57 = vld [vmem:[#allocation2 + $0x330] sm:$0xff]  ;;  %v1608_v1 = vpack.c.bf16 %v245_v55, %v242_v54  ;;  %v206_v26 = vld [vmem:[#allocation2 + $0x400] sm:$0xff]  ;;  %v201_v33 = vld [vmem:[#allocation2 + $0x3d8] sm:$0xff] }
  0x7d   :  { %742 = vmatmul.mubr.f32.vlgmr.msra.gmra.mrb[2].mxu1 %v71_v41  ;;  %v198_v32 = vld [vmem:[#allocation2 + $0x3c0] sm:$0xff]  ;;  %v205_v34 = vld [vmem:[#allocation2 + $0x3f8] sm:$0xff]  ;;  %v208_v35 = vld [vmem:[#allocation2 + $0x410] sm:$0xff] }
  0x7e   :  { %1599 = vmatpush3.bf16.msra.mxu1 %v1598_v36  ;;  %811 = vmatprep.mubr.f32.mxu1 %v74_v63  ;;  %v1618_v36 = vpack.c.bf16 %v209_v27, %v206_v26  ;;  %v212_v38 = vld [vmem:[#allocation2 + $0x430] sm:$0xff]  ;;  %v215_v39 = vld [vmem:[#allocation2 + $0x448] sm:$0xff]  ;;  %v269_v42 = vld [vmem:[#allocation2 + $0x5f8] sm:$0xff]  ;;  %v1452_v43 = vpack.c.bf16 %v208_v35, %v205_v34 }
  0x7f   :  { %1419 = vmatpush1.bf16.msra.mxu0 %v1418_v4  ;;  %1601 = vmatprep.subr.bf16.mxu1 %v1600_v37  ;;  %v1438_v4 = vpack.c.bf16 %v183_v58, %v180_v57  ;;  %v1620_v37 = vpack.c.bf16 %v263_v30, %v260_v29  ;;  %v207_v45 = vld [vmem:[#allocation2 + $0x408] sm:$0xff]  ;;  %v214_v47 = vld [vmem:[#allocation2 + $0x440] sm:$0xff]  ;;  %v1622_v48 = vpack.c.bf16 %v215_v39, %v212_v38  ;;  %v221_v51 = vld [vmem:[#allocation2 + $0x478] sm:$0xff] }
  0x80   :  { %1421 = vmatprep.subr.bf16.mxu0 %v1420_v7  ;;  %v1440_v7 = vpack.c.bf16 %v190_v60, %v187_v59  ;;  %v211_v46 = vld [vmem:[#allocation2 + $0x428] sm:$0xff]  ;;  %v213_v57 = vld [vmem:[#allocation2 + $0x438] sm:$0xff]  ;;  %v220_v59 = vld [vmem:[#allocation2 + $0x470] sm:$0xff] }
  0x81   :  { %v323_v54 = vld [vmem:[#allocation2 + $0x7a8] sm:$0xff]  ;;  %v1456_v55 = vpack.c.bf16 %v214_v47, %v211_v46  ;;  %v217_v58 = vld [vmem:[#allocation2 + $0x458] sm:$0xff]  ;;  %v326_v3 = vld [vmem:[#allocation2 + $0x7c0] sm:$0xff] }
  0x82   :  { %1603 = vmatpush3.bf16.msra.mxu1 %v1602_v49  ;;  %v1460_v5 = vpack.c.bf16 %v220_v59, %v217_v58  ;;  %v216_v6 = vld [vmem:[#allocation2 + $0x450] sm:$0xff]  ;;  %v1948_v14 = vld [vmem:[%s1984_s0 + $0x28] sm:$0xff]  ;;  %v338_v29 = vld [vmem:[#allocation2 + $0x820] sm:$0xff] }
  0x83   :  { %1423 = vmatpush1.bf16.msra.mxu0 %v1422_v16  ;;  %1605 = vmatprep.subr.bf16.mxu1 %v1604_v50  ;;  %v1442_v16 = vpack.c.bf16 %v189_v9, %v186_v8  ;;  %v218_v50 = vld [vmem:[#allocation2 + $0x460] sm:$0xff]  ;;  %v223_v8 = vld [vmem:[#allocation2 + $0x488] sm:$0xff]  ;;  %v332_v17 = vld [vmem:[#allocation2 + $0x7f0] sm:$0xff] }
  0x84   :  { %1425 = vmatprep.subr.bf16.mxu0 %v1424_v19  ;;  %v1444_v19 = vpack.c.bf16 %v196_v11, %v193_v10  ;;  %v1626_v60 = vpack.c.bf16 %v221_v51, %v218_v50  ;;  %v226_v9 = vld [vmem:[#allocation2 + $0x4a0] sm:$0xff]  ;;  %v335_v18 = vld [vmem:[#allocation2 + $0x808] sm:$0xff]  ;;  %v284_v26 = vld [vmem:[#allocation2 + $0x670] sm:$0xff] }
  0x85   :  { %v287_v27 = vld [vmem:[#allocation2 + $0x688] sm:$0xff]  ;;  %v341_v30 = vld [vmem:[#allocation2 + $0x838] sm:$0xff]  ;;  %v238_v35 = vld [vmem:[#allocation2 + $0x500] sm:$0xff] }
  0x86   :  { %1607 = vmatpush3.bf16.msra.mxu1 %v1606_v62  ;;  %v235_v34 = vld [vmem:[#allocation2 + $0x4e8] sm:$0xff]  ;;  %v290_v38 = vld [vmem:[#allocation2 + $0x6a0] sm:$0xff]  ;;  %v293_v39 = vld [vmem:[#allocation2 + $0x6b8] sm:$0xff] }
  0x87   :  { %1427 = vmatpush1.bf16.msra.mxu0 %v1426_v28  ;;  %1609 = vmatprep.subr.bf16.mxu1 %v1608_v1  ;;  %v1446_v28 = vpack.c.bf16 %v195_v21, %v192_v20  ;;  %v275_v1 = vld [vmem:[#allocation2 + $0x628] sm:$0xff]  ;;  %v222_v20 = vld [vmem:[#allocation2 + $0x480] sm:$0xff]  ;;  %v225_v21 = vld [vmem:[#allocation2 + $0x498] sm:$0xff] }
  0x88   :  { %1429 = vmatprep.subr.bf16.mxu0 %v1428_v31  ;;  %v1448_v31 = vpack.c.bf16 %v202_v23, %v199_v22  ;;  %v229_v22 = vld [vmem:[#allocation2 + $0x4b8] sm:$0xff]  ;;  %v232_v23 = vld [vmem:[#allocation2 + $0x4d0] sm:$0xff]  ;;  %v299_v51 = vld [vmem:[#allocation2 + $0x6e8] sm:$0xff] }
  0x89   :  { %v241_v46 = vld [vmem:[#allocation2 + $0x518] sm:$0xff]  ;;  %v244_v47 = vld [vmem:[#allocation2 + $0x530] sm:$0xff]  ;;  %v247_v58 = vld [vmem:[#allocation2 + $0x548] sm:$0xff] }
  0x8a   :  { %1611 = vmatpush3.bf16.msra.mxu1 %v1610_v12  ;;  %v278_v12 = vld [vmem:[#allocation2 + $0x640] sm:$0xff]  ;;  %v296_v50 = vld [vmem:[#allocation2 + $0x6d0] sm:$0xff] }
  0x8b   :  { %1431 = vmatpush1.bf16.msra.mxu0 %v1430_v40  ;;  %1613 = vmatprep.subr.bf16.mxu1 %v1612_v13  ;;  %v1450_v40 = vpack.c.bf16 %v201_v33, %v198_v32  ;;  %v281_v13 = vld [vmem:[#allocation2 + $0x658] sm:$0xff]  ;;  %v228_v32 = vld [vmem:[#allocation2 + $0x4b0] sm:$0xff]  ;;  %v231_v33 = vld [vmem:[#allocation2 + $0x4c8] sm:$0xff] }
  0x8c   :  { %1433 = vmatprep.subr.bf16.mxu0 %v1432_v44  ;;  %v204_v44 = vld [vmem:[#allocation2 + $0x3f0] sm:$0xff]  ;;  %v250_v59 = vld [vmem:[#allocation2 + $0x560] sm:$0xff] }
  0x8d   :  { %v1454_v52 = vpack.c.bf16 %v207_v45, %v204_v44  ;;  %v234_v44 = vld [vmem:[#allocation2 + $0x4e0] sm:$0xff]  ;;  %v237_v45 = vld [vmem:[#allocation2 + $0x4f8] sm:$0xff] }
  0x8e   :  { %458 = vmatmul.mubr.f32.vlgmr.msra.gmra.mrb[0].mxu0 %v71_v41  ;;  %1615 = vmatpush3.bf16.msra.mxu1 %v1614_v24  ;;  %v266_v41 = vld [vmem:[#allocation2 + $0x5e0] sm:$0xff]  ;;  %v1634_v24 = vpack.c.bf16 %v281_v13, %v278_v12  ;;  %v308_v12 = vld [vmem:[#allocation2 + $0x730] sm:$0xff]  ;;  %v311_v13 = vld [vmem:[#allocation2 + $0x748] sm:$0xff] }
  0x8f   :  { %1435 = vmatpush1.bf16.msra.mxu0 %v1434_v53  ;;  %528 = vmatprep.mubr.f32.mxu0 %v74_v63  ;;  %v1624_v49 = vpack.c.bf16 %v269_v42, %v266_v41  ;;  %v320_v53 = vld [vmem:[#allocation2 + $0x790] sm:$0xff]  ;;  %v347_v42 = vld [vmem:[#allocation2 + $0x868] sm:$0xff] }
  0x90   :  { %1437 = vmatprep.subr.bf16.mxu0 %v1436_v56  ;;  %1617 = vmatprep.subr.bf16.mxu1 %v1616_v25  ;;  %v210_v56 = vld [vmem:[#allocation2 + $0x420] sm:$0xff]  ;;  %v1628_v62 = vpack.c.bf16 %v323_v54, %v320_v53  ;;  %v272_v63 = vld [vmem:[#allocation2 + $0x610] sm:$0xff]  ;;  %v1636_v25 = vpack.c.bf16 %v335_v18, %v332_v17  ;;  %v353_v54 = vld [vmem:[#allocation2 + $0x898] sm:$0xff] }
  0x91   :  { %v1458_v2 = vpack.c.bf16 %v213_v57, %v210_v56  ;;  %v1630_v10 = vpack.c.bf16 %v275_v1, %v272_v63  ;;  %v344_v41 = vld [vmem:[#allocation2 + $0x850] sm:$0xff]  ;;  %v350_v53 = vld [vmem:[#allocation2 + $0x880] sm:$0xff]  ;;  %v243_v57 = vld [vmem:[#allocation2 + $0x528] sm:$0xff] }
  0x92   :  { %1619 = vmatpush3.bf16.msra.mxu1 %v1618_v36  ;;  %v1638_v36 = vpack.c.bf16 %v287_v27, %v284_v26  ;;  %v240_v56 = vld [vmem:[#allocation2 + $0x510] sm:$0xff]  ;;  %v302_v63 = vld [vmem:[#allocation2 + $0x700] sm:$0xff]  ;;  %v305_v1 = vld [vmem:[#allocation2 + $0x718] sm:$0xff] }
  0x93   :  { %1439 = vmatpush1.bf16.msra.mxu0 %v1438_v4  ;;  %1621 = vmatprep.subr.bf16.mxu1 %v1620_v37  ;;  %v329_v4 = vld [vmem:[#allocation2 + $0x7d8] sm:$0xff]  ;;  %v1640_v37 = vpack.c.bf16 %v341_v30, %v338_v29  ;;  %v362_v17 = vld [vmem:[#allocation2 + $0x8e0] sm:$0xff] }
  0x94   :  { %1441 = vmatprep.subr.bf16.mxu0 %v1440_v7  ;;  %v219_v7 = vld [vmem:[#allocation2 + $0x468] sm:$0xff]  ;;  %v1632_v11 = vpack.c.bf16 %v329_v4, %v326_v3  ;;  %v356_v3 = vld [vmem:[#allocation2 + $0x8b0] sm:$0xff]  ;;  %v365_v18 = vld [vmem:[#allocation2 + $0x8f8] sm:$0xff] }
  0x95   :  { %v1462_v15 = vpack.c.bf16 %v219_v7, %v216_v6  ;;  %v359_v4 = vld [vmem:[#allocation2 + $0x8c8] sm:$0xff]  ;;  %v246_v6 = vld [vmem:[#allocation2 + $0x540] sm:$0xff]  ;;  %v249_v7 = vld [vmem:[#allocation2 + $0x558] sm:$0xff] }
  0x96   :  { %1623 = vmatpush3.bf16.msra.mxu1 %v1622_v48  ;;  %v1642_v48 = vpack.c.bf16 %v293_v39, %v290_v38  ;;  %v314_v26 = vld [vmem:[#allocation2 + $0x760] sm:$0xff]  ;;  %v317_v27 = vld [vmem:[#allocation2 + $0x778] sm:$0xff]  ;;  %v264_v39 = vld [vmem:[#allocation2 + $0x5d0] sm:$0xff] }
  0x97   :  { %1443 = vmatpush1.bf16.msra.mxu0 %v1442_v16  ;;  %1625 = vmatprep.subr.bf16.mxu1 %v1624_v49  ;;  %v1953_v16 = vld [vmem:[%s1984_s0 + $0x10] sm:$0xff]  ;;  %v1644_v49 = vpack.c.bf16 %v347_v42, %v344_v41  ;;  %v258_v30 = vld [vmem:[#allocation2 + $0x5a0] sm:$0xff]  ;;  %v271_v41 = vld [vmem:[#allocation2 + $0x608] sm:$0xff] }
  0x98   :  { %1445 = vmatprep.subr.bf16.mxu0 %v1444_v19  ;;  %v1464_v19 = vpack.c.bf16 %v226_v9, %v223_v8  ;;  %v253_v8 = vld [vmem:[#allocation2 + $0x578] sm:$0xff]  ;;  %v256_v9 = vld [vmem:[#allocation2 + $0x590] sm:$0xff]  ;;  %v274_v42 = vld [vmem:[#allocation2 + $0x620] sm:$0xff] }
  0x9a   :  { %1627 = vmatpush3.bf16.msra.mxu1 %v1626_v60  ;;  %v1646_v60 = vpack.c.bf16 %v299_v51, %v296_v50  ;;  %v277_v50 = vld [vmem:[#allocation2 + $0x638] sm:$0xff]  ;;  %v280_v51 = vld [vmem:[#allocation2 + $0x650] sm:$0xff] }
  0x9b   :  { %1447 = vmatpush1.bf16.msra.mxu0 %v1446_v28  ;;  %1629 = vmatprep.subr.bf16.mxu1 %v1628_v62  ;;  %v1466_v28 = vpack.c.bf16 %v225_v21, %v222_v20  ;;  %v1648_v62 = vpack.c.bf16 %v353_v54, %v350_v53  ;;  %v252_v20 = vld [vmem:[#allocation2 + $0x570] sm:$0xff]  ;;  %v255_v21 = vld [vmem:[#allocation2 + $0x588] sm:$0xff]  ;;  %v1500_v53 = vpack.c.bf16 %v280_v51, %v277_v50 }
  0x9c   :  { %1449 = vmatprep.subr.bf16.mxu0 %v1448_v31  ;;  %v1468_v31 = vpack.c.bf16 %v232_v23, %v229_v22  ;;  %v259_v22 = vld [vmem:[#allocation2 + $0x5a8] sm:$0xff]  ;;  %v262_v23 = vld [vmem:[#allocation2 + $0x5c0] sm:$0xff]  ;;  %v276_v54 = vld [vmem:[#allocation2 + $0x630] sm:$0xff] }
  0x9d   :  { %812 = vmatmul.mubr.f32.vlgmr.msra.gmra.mrb[4].mxu1 %v1953_v16  ;;  %v1488_v29 = vpack.c.bf16 %v262_v23, %v259_v22  ;;  %v309_v22 = vld [vmem:[#allocation2 + $0x738] sm:$0xff]  ;;  %v340_v50 = vld [vmem:[#allocation2 + $0x830] sm:$0xff] }
  0x9e   :  { %1631 = vmatpush3.bf16.msra.mxu1 %v1630_v10  ;;  %881 = vmatprep.mubr.f32.mxu1 %v1948_v14  ;;  %v1650_v10 = vpack.c.bf16 %v305_v1, %v302_v63  ;;  %v289_v63 = vld [vmem:[#allocation2 + $0x698] sm:$0xff]  ;;  %v292_v1 = vld [vmem:[#allocation2 + $0x6b0] sm:$0xff] }
  0x9f   :  { %1451 = vmatpush1.bf16.msra.mxu0 %v1450_v40  ;;  %1633 = vmatprep.subr.bf16.mxu1 %v1632_v11  ;;  %v1470_v40 = vpack.c.bf16 %v231_v33, %v228_v32  ;;  %v1652_v11 = vpack.c.bf16 %v359_v4, %v356_v3  ;;  %v265_v32 = vld [vmem:[#allocation2 + $0x5d8] sm:$0xff]  ;;  %v268_v33 = vld [vmem:[#allocation2 + $0x5f0] sm:$0xff]  ;;  %v1508_v3 = vpack.c.bf16 %v292_v1, %v289_v63 }
  0xa0   :  { %1453 = vmatprep.subr.bf16.mxu0 %v1452_v43  ;;  %v1472_v43 = vpack.c.bf16 %v238_v35, %v235_v34  ;;  %v1658_v34 = vpack.c.bf16 %v317_v27, %v314_v26  ;;  %v368_v35 = vld [vmem:[#allocation2 + $0x910] sm:$0xff]  ;;  %v1492_v38 = vpack.c.bf16 %v268_v33, %v265_v32  ;;  %v313_v23 = vld [vmem:[#allocation2 + $0x758] sm:$0xff]  ;;  %v318_v33 = vld [vmem:[#allocation2 + $0x780] sm:$0xff] }
  0xa1   :  { %v288_v4 = vld [vmem:[#allocation2 + $0x690] sm:$0xff] }
  0xa2   :  { %1635 = vmatpush3.bf16.msra.mxu1 %v1634_v24  ;;  %v1654_v24 = vpack.c.bf16 %v311_v13, %v308_v12  ;;  %v300_v13 = vld [vmem:[#allocation2 + $0x6f0] sm:$0xff] }
  0xa3   :  { %1455 = vmatpush1.bf16.msra.mxu0 %v1454_v52  ;;  %1637 = vmatprep.subr.bf16.mxu1 %v1636_v25  ;;  %v1474_v52 = vpack.c.bf16 %v237_v45, %v234_v44  ;;  %v1656_v25 = vpack.c.bf16 %v365_v18, %v362_v17  ;;  %v1841_v45 = vmov 0.0|0.0   ;;  %v307_v17 = vld [vmem:[#allocation2 + $0x728] sm:$0xff]  ;;  %v310_v18 = vld [vmem:[#allocation2 + $0x740] sm:$0xff]  ;;  %v312_v27 = vld [vmem:[#allocation2 + $0x750] sm:$0xff] }
  0xa4   :  { %1457 = vmatprep.subr.bf16.mxu0 %v1456_v55  ;;  %v1476_v55 = vpack.c.bf16 %v244_v47, %v241_v46  ;;  %v1496_v47 = vpack.c.bf16 %v274_v42, %v271_v41  ;;  %v331_v41 = vld [vmem:[#allocation2 + $0x7e8] sm:$0xff]  ;;  %v334_v42 = vld [vmem:[#allocation2 + $0x800] sm:$0xff]  ;;  %v352_v63 = vld [vmem:[#allocation2 + $0x890] sm:$0xff] }
  0xa6   :  { %1639 = vmatpush3.bf16.msra.mxu1 %v1638_v36  ;;  %v371_v36 = vld [vmem:[#allocation2 + $0x928] sm:$0xff] }
  0xa7   :  { %1459 = vmatpush1.bf16.msra.mxu0 %v1458_v2  ;;  %1641 = vmatprep.subr.bf16.mxu1 %v1640_v37  ;;  %v1478_v2 = vpack.c.bf16 %v243_v57, %v240_v56  ;;  %v1661_v44 = vpack.c.bf16 %v371_v36, %v368_v35  ;;  %v283_v56 = vld [vmem:[#allocation2 + $0x668] sm:$0xff]  ;;  %v286_v57 = vld [vmem:[#allocation2 + $0x680] sm:$0xff]  ;;  %v325_v35 = vld [vmem:[#allocation2 + $0x7b8] sm:$0xff] }
  0xa8   :  { %1461 = vmatprep.subr.bf16.mxu0 %v1460_v5  ;;  %v1480_v5 = vpack.c.bf16 %v250_v59, %v247_v58  ;;  %v1504_v59 = vpack.c.bf16 %v286_v57, %v283_v56  ;;  %v328_v36 = vld [vmem:[#allocation2 + $0x7d0] sm:$0xff]  ;;  %v346_v56 = vld [vmem:[#allocation2 + $0x860] sm:$0xff] }
  0xaa   :  { %1643 = vmatpush3.bf16.msra.mxu1 %v1642_v48  ;;  %v270_v48 = vld [vmem:[#allocation2 + $0x600] sm:$0xff] }
  0xab   :  { %1463 = vmatpush1.bf16.msra.mxu0 %v1462_v15  ;;  %1645 = vmatprep.subr.bf16.mxu1 %v1644_v49  ;;  %v1482_v15 = vpack.c.bf16 %v249_v7, %v246_v6  ;;  %v273_v49 = vld [vmem:[#allocation2 + $0x618] sm:$0xff]  ;;  %v298_v6 = vld [vmem:[#allocation2 + $0x6e0] sm:$0xff] }
  0xac   :  { %1465 = vmatprep.subr.bf16.mxu0 %v1464_v19  ;;  %v1484_v19 = vpack.c.bf16 %v256_v9, %v253_v8  ;;  %v294_v8 = vld [vmem:[#allocation2 + $0x6c0] sm:$0xff]  ;;  %v301_v9 = vld [vmem:[#allocation2 + $0x6f8] sm:$0xff] }
  0xae   :  { %1647 = vmatpush3.bf16.msra.mxu1 %v1646_v60  ;;  %v282_v60 = vld [vmem:[#allocation2 + $0x660] sm:$0xff] }
  0xaf   :  { %1467 = vmatpush1.bf16.msra.mxu0 %v1466_v28  ;;  %1649 = vmatprep.subr.bf16.mxu1 %v1648_v62  ;;  %v1486_v28 = vpack.c.bf16 %v255_v21, %v252_v20  ;;  %v285_v62 = vld [vmem:[#allocation2 + $0x678] sm:$0xff]  ;;  %v1520_v20 = vpack.c.bf16 %v310_v18, %v307_v17  ;;  %v306_v21 = vld [vmem:[#allocation2 + $0x720] sm:$0xff] }
  0xb0   :  { %1469 = vmatprep.subr.bf16.mxu0 %v1468_v31  ;;  %v261_v31 = vld [vmem:[#allocation2 + $0x5b8] sm:$0xff] }
  0xb1   :  { %v1490_v37 = vpack.c.bf16 %v261_v31, %v258_v30  ;;  %v322_v30 = vld [vmem:[#allocation2 + $0x7a0] sm:$0xff]  ;;  %v976_v17 = vld [vmem:[#allocation6 + $0x80] sm:$0xff] }
  0xb2   :  { %1651 = vmatpush3.bf16.msra.mxu1 %v1650_v10  ;;  %v304_v10 = vld [vmem:[#allocation2 + $0x710] sm:$0xff]  ;;  %v977_v18 = vld [vmem:[#allocation6 + $0x88] sm:$0xff] }
  0xb3   :  { %1471 = vmatpush1.bf16.msra.mxu0 %v1470_v40  ;;  %1653 = vmatprep.subr.bf16.mxu1 %v1652_v11  ;;  %v267_v40 = vld [vmem:[#allocation2 + $0x5e8] sm:$0xff]  ;;  %v1516_v12 = vpack.c.bf16 %v304_v10, %v301_v9  ;;  %v364_v9 = vld [vmem:[#allocation2 + $0x8f0] sm:$0xff] }
  0xb4   :  { %1473 = vmatprep.subr.bf16.mxu0 %v1472_v43  ;;  %v1960_v43 = vld [vmem:[%s1984_s0 + $0x20] sm:$0xff]  ;;  %v1494_v46 = vpack.c.bf16 %v267_v40, %v264_v39  ;;  %v324_v39 = vld [vmem:[#allocation2 + $0x7b0] sm:$0xff]  ;;  %v327_v40 = vld [vmem:[#allocation2 + $0x7c8] sm:$0xff] }
  0xb6   :  { %1655 = vmatpush3.bf16.msra.mxu1 %v1654_v24  ;;  %v316_v24 = vld [vmem:[#allocation2 + $0x770] sm:$0xff] }
  0xb7   :  { %1475 = vmatpush1.bf16.msra.mxu0 %v1474_v52  ;;  %1657 = vmatprep.subr.bf16.mxu1 %v1656_v25  ;;  %v1498_v52 = vpack.c.bf16 %v273_v49, %v270_v48  ;;  %v1522_v25 = vpack.c.bf16 %v309_v22, %v306_v21  ;;  %v1524_v26 = vpack.c.bf16 %v316_v24, %v313_v23  ;;  %v333_v48 = vld [vmem:[#allocation2 + $0x7f8] sm:$0xff]  ;;  %v978_v22 = vld [vmem:[#allocation6 + $0x90] sm:$0xff]  ;;  %v979_v23 = vld [vmem:[#allocation6 + $0x98] sm:$0xff] }
  0xb8   :  { %1477 = vmatprep.subr.bf16.mxu0 %v1476_v55  ;;  %v279_v55 = vld [vmem:[#allocation2 + $0x648] sm:$0xff]  ;;  %v337_v49 = vld [vmem:[#allocation2 + $0x818] sm:$0xff] }
  0xb9   :  { %v1502_v58 = vpack.c.bf16 %v279_v55, %v276_v54  ;;  %v339_v54 = vld [vmem:[#allocation2 + $0x828] sm:$0xff]  ;;  %v961_v21 = vld [vmem:[#allocation6 + $0x8] sm:$0xff] }
  0xba   :  { %1659 = vmatpush3.bf16.msra.mxu1 %v1658_v34  ;;  %v321_v34 = vld [vmem:[#allocation2 + $0x798] sm:$0xff]  ;;  %v343_v55 = vld [vmem:[#allocation2 + $0x848] sm:$0xff] }
  0xbb   :  { %1479 = vmatpush1.bf16.msra.mxu0 %v1478_v2  ;;  %1660 = vmatprep.subr.bf16.mxu1 %v1841_v45  ;;  %v1506_v2 = vpack.c.bf16 %v285_v62, %v282_v60  ;;  %v345_v60 = vld [vmem:[#allocation2 + $0x858] sm:$0xff] }
  0xbc   :  { %1481 = vmatprep.subr.bf16.mxu0 %v1480_v5  ;;  %v295_v5 = vld [vmem:[#allocation2 + $0x6c8] sm:$0xff]  ;;  %v349_v62 = vld [vmem:[#allocation2 + $0x878] sm:$0xff] }
  0xbd   :  { %882 = vmatmul.mubr.f32.vlgmr.msra.gmra.mrb[6].mxu1 %v1960_v43  ;;  %v1512_v7 = vpack.c.bf16 %v298_v6, %v295_v5  ;;  %v358_v5 = vld [vmem:[#allocation2 + $0x8c0] sm:$0xff] }
  0xbe   :  { %1662 = vmatpush3.bf16.msra.mxu1 %v1661_v44  ;;  %1330 = vmatprep.mubr.msk.f32.mxu1 %vm1842_vm1, %v1840_v0  ;;  %v1534_v44 = vpack.c.bf16 %v327_v40, %v324_v39  ;;  %v984_v39 = vld [vmem:[#allocation6 + $0xc0] sm:$0xff]  ;;  %v985_v40 = vld [vmem:[#allocation6 + $0xc8] sm:$0xff] }
  0xbf   :  { %1483 = vmatpush1.bf16.msra.mxu0 %v1482_v15  ;;  %v303_v15 = vld [vmem:[#allocation2 + $0x708] sm:$0xff] }
  0xc0   :  { %1485 = vmatprep.subr.bf16.mxu0 %v1484_v19  ;;  %v1518_v19 = vpack.c.bf16 %v303_v15, %v300_v13  ;;  %v363_v13 = vld [vmem:[#allocation2 + $0x8e8] sm:$0xff] }
  0xc1   :  { %1331 = vmatmul.mubr.msk.f32.vlgmr.msra.gmra.mrb[8].mxu1 %vm389_vm0, %v1935_v61  ;;  %v291_v61 = vld [vmem:[#allocation2 + $0x6a8] sm:$0xff] }
  0xc3   :  { %1487 = vmatpush1.bf16.msra.mxu0 %v1486_v28  ;;  %v315_v28 = vld [vmem:[#allocation2 + $0x768] sm:$0xff] }
  0xc4   :  { %1489 = vmatprep.subr.bf16.mxu0 %v1488_v29  ;;  %v319_v29 = vld [vmem:[#allocation2 + $0x788] sm:$0xff]  ;;  %v1526_v31 = vpack.c.bf16 %v315_v28, %v312_v27  ;;  %v980_v28 = vld [vmem:[#allocation6 + $0xa0] sm:$0xff] }
  0xc5   :  { %v1528_v32 = vpack.c.bf16 %v322_v30, %v319_v29  ;;  %v963_v27 = vld [vmem:[#allocation6 + $0x18] sm:$0xff]  ;;  %v981_v29 = vld [vmem:[#allocation6 + $0xa8] sm:$0xff] }
  0xc7   :  { %1491 = vmatpush1.bf16.msra.mxu0 %v1490_v37  ;;  %v1530_v37 = vpack.c.bf16 %v321_v34, %v318_v33  ;;  %v982_v33 = vld [vmem:[#allocation6 + $0xb0] sm:$0xff]  ;;  %v983_v34 = vld [vmem:[#allocation6 + $0xb8] sm:$0xff] }
  0xc8   :  { %1493 = vmatprep.subr.bf16.mxu0 %v1492_v38  ;;  %v1532_v38 = vpack.c.bf16 %v328_v36, %v325_v35  ;;  %v1675_v36 = vpack.c.bf16 %v983_v34, %v982_v33  ;;  %v992_v33 = vld [vmem:[#allocation6 + $0x100] sm:$0xff]  ;;  %v993_v34 = vld [vmem:[#allocation6 + $0x108] sm:$0xff] }
  0xcb   :  { %1495 = vmatpush1.bf16.msra.mxu0 %v1494_v46  ;;  %v1536_v46 = vpack.c.bf16 %v334_v42, %v331_v41  ;;  %v1679_v42 = vpack.c.bf16 %v985_v40, %v984_v39  ;;  %v994_v39 = vld [vmem:[#allocation6 + $0x110] sm:$0xff]  ;;  %v995_v40 = vld [vmem:[#allocation6 + $0x118] sm:$0xff] }
  0xcc   :  { %1497 = vmatprep.subr.bf16.mxu0 %v1496_v47  ;;  %v330_v47 = vld [vmem:[#allocation2 + $0x7e0] sm:$0xff] }
  0xcd   :  { %v1538_v51 = vpack.c.bf16 %v333_v48, %v330_v47  ;;  %v986_v47 = vld [vmem:[#allocation6 + $0xd0] sm:$0xff]  ;;  %v987_v48 = vld [vmem:[#allocation6 + $0xd8] sm:$0xff] }
  0xce   :  { %529 = vmatmul.mubr.f32.vlgmr.msra.gmra.mrb[0].mxu0 %v1953_v16  ;;  %v1510_v16 = vpack.c.bf16 %v291_v61, %v288_v4  ;;  %v351_v4 = vld [vmem:[#allocation2 + $0x888] sm:$0xff] }
  0xcf   :  { %1499 = vmatpush1.bf16.msra.mxu0 %v1498_v52  ;;  %599 = vmatprep.mubr.f32.mxu0 %v1948_v14  ;;  %v297_v14 = vld [vmem:[#allocation2 + $0x6d8] sm:$0xff]  ;;  %v1540_v52 = vpack.c.bf16 %v340_v50, %v337_v49  ;;  %v355_v61 = vld [vmem:[#allocation2 + $0x8a8] sm:$0xff]  ;;  %v1683_v50 = vpack.c.bf16 %v987_v48, %v986_v47 }
  0xd0   :  { %1501 = vmatprep.subr.bf16.mxu0 %v1500_v53  ;;  %v1514_v11 = vpack.c.bf16 %v297_v14, %v294_v8  ;;  %v336_v53 = vld [vmem:[#allocation2 + $0x810] sm:$0xff]  ;;  %v357_v8 = vld [vmem:[#allocation2 + $0x8b8] sm:$0xff]  ;;  %v998_v47 = vld [vmem:[#allocation6 + $0x130] sm:$0xff] }
  0xd1   :  { %v1542_v57 = vpack.c.bf16 %v339_v54, %v336_v53  ;;  %v361_v14 = vld [vmem:[#allocation2 + $0x8d8] sm:$0xff]  ;;  %v999_v48 = vld [vmem:[#allocation6 + $0x138] sm:$0xff] }
  0xd3   :  { %1503 = vmatpush1.bf16.msra.mxu0 %v1502_v58  ;;  %v1544_v58 = vpack.c.bf16 %v346_v56, %v343_v55 }
  0xd4   :  { %1505 = vmatprep.subr.bf16.mxu0 %v1504_v59  ;;  %v342_v59 = vld [vmem:[#allocation2 + $0x840] sm:$0xff] }
  0xd5   :  { %v1546_v1 = vpack.c.bf16 %v345_v60, %v342_v59  ;;  %v988_v59 = vld [vmem:[#allocation6 + $0xe0] sm:$0xff]  ;;  %v989_v60 = vld [vmem:[#allocation6 + $0xe8] sm:$0xff] }
  0xd7   :  { %1507 = vmatpush1.bf16.msra.mxu0 %v1506_v2  ;;  %v1548_v2 = vpack.c.bf16 %v352_v63, %v349_v62  ;;  %v1687_v62 = vpack.c.bf16 %v989_v60, %v988_v59  ;;  %v972_v63 = vld [vmem:[#allocation6 + $0x60] sm:$0xff]  ;;  %v1007_v59 = vld [vmem:[#allocation6 + $0x178] sm:$0xff] }
  0xd8   :  { %1509 = vmatprep.subr.bf16.mxu0 %v1508_v3  ;;  %v348_v3 = vld [vmem:[#allocation2 + $0x870] sm:$0xff] }
  0xd9   :  { %v1550_v6 = vpack.c.bf16 %v351_v4, %v348_v3  ;;  %v990_v3 = vld [vmem:[#allocation6 + $0xf0] sm:$0xff]  ;;  %v991_v4 = vld [vmem:[#allocation6 + $0xf8] sm:$0xff] }
  0xdb   :  { %1511 = vmatpush1.bf16.msra.mxu0 %v1510_v16  ;;  %v1552_v16 = vpack.c.bf16 %v358_v5, %v355_v61  ;;  %v1691_v61 = vpack.c.bf16 %v991_v4, %v990_v3  ;;  %v974_v5 = vld [vmem:[#allocation6 + $0x70] sm:$0xff]  ;;  %v1165_v3 = vld [vmem:[#allocation7] ss:$0 sm:$0xff] }
  0xdc   :  { %1513 = vmatprep.subr.bf16.mxu0 %v1512_v7  ;;  %v354_v7 = vld [vmem:[#allocation2 + $0x8a0] sm:$0xff] }
  0xdd   :  { %v1554_v10 = vpack.c.bf16 %v357_v8, %v354_v7  ;;  %v374_v7 = vlaneseq }
  0xdf   :  { %1515 = vmatpush1.bf16.msra.mxu0 %v1514_v11  ;;  %v1556_v11 = vpack.c.bf16 %v364_v9, %v361_v14  ;;  %v375_v8 = vshrl.u32 %v374_v7, 7  ;;  %v372_v9 = vld [vmem:[#allocation4] sm:$0x7] }
  0xe0   :  { %1517 = vmatprep.subr.bf16.mxu0 %v1516_v12  ;;  %v360_v12 = vld [vmem:[#allocation2 + $0x8d0] sm:$0xff] }
  0xe1   :  { %v1558_v15 = vpack.c.bf16 %v363_v13, %v360_v12  ;;  %v384_v14 = vsub.s32 2, %v375_v8 }
  0xe3   :  { %1519 = vmatpush1.bf16.msra.mxu0 %v1518_v19  ;;  %v960_v19 = vld [vmem:[#allocation6] sm:$0xff] }
  0xe4   :  { %1521 = vmatprep.subr.bf16.mxu0 %v1520_v20  ;;  %v1663_v20 = vpack.c.bf16 %v977_v18, %v976_v17  ;;  %v1665_v24 = vpack.c.bf16 %v961_v21, %v960_v19 }
  0xe6   :  { %1664 = vmatprep.subr.bf16.mxu1 %v1663_v20 }
  0xe7   :  { %1523 = vmatpush1.bf16.msra.mxu0 %v1522_v25  ;;  %v1667_v25 = vpack.c.bf16 %v979_v23, %v978_v22  ;;  %1666 = vmatpush3.bf16.msra.mxu1 %v1665_v24 }
  0xe8   :  { %1525 = vmatprep.subr.bf16.mxu0 %v1524_v26  ;;  %v962_v26 = vld [vmem:[#allocation6 + $0x10] sm:$0xff] }
  0xe9   :  { %v1669_v30 = vpack.c.bf16 %v963_v27, %v962_v26  ;;  %1668 = vmatprep.subr.bf16.mxu1 %v1667_v25  ;;  %v376_v25 = vsub.s32 0, %v375_v8  ;;  %v380_v26 = vsub.s32 1, %v375_v8 }
  0xeb   :  { %1527 = vmatpush1.bf16.msra.mxu0 %v1526_v31  ;;  %v1671_v31 = vpack.c.bf16 %v981_v29, %v980_v28  ;;  %1670 = vmatpush3.bf16.msra.mxu1 %v1669_v30  ;;  %v377_v27 = vrot.slane %v372_v9, %v376_v25  ;;  %v381_v28 = vrot.slane %v372_v9, %v380_v26 }
  0xec   :  { %1529 = vmatprep.subr.bf16.mxu0 %v1528_v32  ;;  %v964_v32 = vld [vmem:[#allocation6 + $0x20] sm:$0xff] }
  0xed   :  { %1672 = vmatprep.subr.bf16.mxu1 %v1671_v31 }
  0xef   :  { %1531 = vmatpush1.bf16.msra.mxu0 %v1530_v37  ;;  %v966_v37 = vld [vmem:[#allocation6 + $0x30] sm:$0xff] }
  0xf0   :  { %1533 = vmatprep.subr.bf16.mxu0 %v1532_v38  ;;  %v967_v38 = vld [vmem:[#allocation6 + $0x38] sm:$0xff] }
  0xf1   :  { %v1677_v41 = vpack.c.bf16 %v967_v38, %v966_v37  ;;  %v1696_v37 = vpack.c.bf16 %v993_v34, %v992_v33 }
  0xf3   :  { %1535 = vmatpush1.bf16.msra.mxu0 %v1534_v44  ;;  %v968_v44 = vld [vmem:[#allocation6 + $0x40] sm:$0xff] }
  0xf4   :  { %1537 = vmatprep.subr.bf16.mxu0 %v1536_v46  ;;  %v969_v46 = vld [vmem:[#allocation6 + $0x48] sm:$0xff] }
  0xf5   :  { %v1681_v49 = vpack.c.bf16 %v969_v46, %v968_v44  ;;  %v997_v44 = vld [vmem:[#allocation6 + $0x128] sm:$0xff] }
  0xf7   :  { %1539 = vmatpush1.bf16.msra.mxu0 %v1538_v51  ;;  %v970_v51 = vld [vmem:[#allocation6 + $0x50] sm:$0xff] }
  0xf8   :  { %1541 = vmatprep.subr.bf16.mxu0 %v1540_v52  ;;  %v971_v52 = vld [vmem:[#allocation6 + $0x58] sm:$0xff] }
  0xf9   :  { %v1685_v53 = vpack.c.bf16 %v971_v52, %v970_v51  ;;  %v1001_v51 = vld [vmem:[#allocation6 + $0x148] sm:$0xff] }
  0xfb   :  { %1543 = vmatpush1.bf16.msra.mxu0 %v1542_v57 }
  0xfc   :  { %1545 = vmatprep.subr.bf16.mxu0 %v1544_v58 }
  0xff   :  { %1547 = vmatpush1.bf16.msra.mxu0 %v1546_v1  ;;  %v973_v1 = vld [vmem:[#allocation6 + $0x68] sm:$0xff] }
 0x100   :  { %1549 = vmatprep.subr.bf16.mxu0 %v1548_v2  ;;  %v1689_v2 = vpack.c.bf16 %v973_v1, %v972_v63 }
 0x103   :  { %1551 = vmatpush1.bf16.msra.mxu0 %v1550_v6  ;;  %v975_v6 = vld [vmem:[#allocation6 + $0x78] sm:$0xff] }
 0x104   :  { %1553 = vmatprep.subr.bf16.mxu0 %v1552_v16  ;;  %v1693_v16 = vpack.c.bf16 %v975_v6, %v974_v5 }
 0x107   :  { %1555 = vmatpush1.bf16.msra.mxu0 %v1554_v10  ;;  %v385_v10 = vrot.slane %v372_v9, %v384_v14 }
 0x108   :  { %1557 = vmatprep.subr.bf16.mxu0 %v1556_v11 }
 0x10b   :  { %1559 = vmatpush1.bf16.msra.mxu0 %v1558_v15 }
 0x10e   :  { %600 = vmatmul.mubr.f32.vlgmr.msra.gmra.mrb[0].mxu0 %v1960_v43  ;;  %v965_v43 = vld [vmem:[#allocation6 + $0x28] sm:$0xff] }
 0x10f   :  { %v1673_v35 = vpack.c.bf16 %v965_v43, %v964_v32 }
 0x111   :  { %1674 = vmatpush3.bf16.msra.mxu1 %v1673_v35 }
 0x112   :  { %1676 = vmatprep.subr.bf16.mxu1 %v1675_v36 }
 0x115   :  { %1678 = vmatpush3.bf16.msra.mxu1 %v1677_v41  ;;  %v1699_v41 = vpack.c.bf16 %v995_v40, %v994_v39 }
 0x116   :  { %1680 = vmatprep.subr.bf16.mxu1 %v1679_v42  ;;  %v996_v42 = vld [vmem:[#allocation6 + $0x120] sm:$0xff] }
 0x117   :  { %v1702_v46 = vpack.c.bf16 %v997_v44, %v996_v42 }
 0x119   :  { %1682 = vmatpush3.bf16.msra.mxu1 %v1681_v49  ;;  %v1705_v49 = vpack.c.bf16 %v999_v48, %v998_v47 }
 0x11a   :  { %1684 = vmatprep.subr.bf16.mxu1 %v1683_v50  ;;  %v1000_v50 = vld [vmem:[#allocation6 + $0x140] sm:$0xff] }
 0x11b   :  { %v1708_v52 = vpack.c.bf16 %v1001_v51, %v1000_v50 }
 0x11d   :  { %1686 = vmatpush3.bf16.msra.mxu1 %v1685_v53  ;;  %v1003_v53 = vld [vmem:[#allocation6 + $0x158] sm:$0xff] }
 0x11e   :  { %1688 = vmatprep.subr.bf16.mxu1 %v1687_v62 }
 0x121   :  { %1690 = vmatpush3.bf16.msra.mxu1 %v1689_v2 }
 0x122   :  { %1692 = vmatprep.subr.bf16.mxu1 %v1691_v61 }
 0x125   :  { %1694 = vmatpush3.bf16.msra.mxu1 %v1693_v16 }
 0x126   :  { %1695 = vmatprep.subr.bf16.mxu1 %v1841_v45 }
 0x130   :  { %v672_v54 = vpop.f32.mrb[0].mxu1 }
 0x131   :  { %v674_v55 = vpop.f32.mrb[1].mxu1 }
 0x150   :  { %v1198_v56 = vpop.f32.mrb[2].mxu1 }
 0x151   :  { %v1199_v57 = vpop.f32.mrb[3].mxu1 }
 0x152   :  { %v1200_v58 = vadd.f32 %v1199_v57, %v1198_v56  ;;  %v1005_v56 = vld [vmem:[#allocation6 + $0x168] sm:$0xff] }
 0x154   :  { %v744_v11 = vadd.f32 %v1200_v58, %v385_v10  ;;  %v1006_v58 = vld [vmem:[#allocation6 + $0x170] sm:$0xff] }
 0x155   :  { %v1717_v60 = vpack.c.bf16 %v1007_v59, %v1006_v58 }
 0x170   :  { %v1233_v12 = vpop.f32.mrb[4].mxu1 }
 0x171   :  { %v1234_v13 = vpop.f32.mrb[5].mxu1 }
 0x172   :  { %v1235_v15 = vadd.f32 %v1234_v13, %v1233_v12 }
 0x174   :  { %v814_v17 = vadd.f32 %v1235_v15, %v744_v11 }
 0x190   :  { %v1268_v18 = vpop.f32.mrb[6].mxu1 }
 0x191   :  { %v1269_v19 = vpop.f32.mrb[7].mxu1 }
 0x192   :  { %v1270_v20 = vadd.f32 %v1269_v19, %v1268_v18 }
 0x194   :  { %v884_v21 = vadd.f32 %v1270_v20, %v814_v17  ;;  %v953_v22 = vpop.f32.mrb[8].mxu1 }
 0x195   :  { %v1332_v23 = vpop.f32.mrb[9].mxu1 }
 0x196   :  { %v954_v24 = vadd.f32 %v953_v22, %v884_v21 }
 0x198   :  { %v959_v62 = vmax.f32 %v954_v24, 0.0 }
 0x1e1   :  { %v601_v29 = vpop.f32.mrb[0].mxu0 }
 0x1e2   :  { %v1719_v30 = vadd.f32 %v601_v29, %v377_v27  ;;  %v603_v31 = vpop.f32.mrb[1].mxu0 }
 0x1e3   :  { %v1721_v32 = vadd.f32 %v603_v31, %v381_v28 }
 0x1e4   :  { %v1720_v43 = vadd.f32 %v1719_v30, %v672_v54 }
 0x1e5   :  { %v1722_v35 = vadd.f32 %v1721_v32, %v674_v55  ;;  %v1004_v55 = vld [vmem:[#allocation6 + $0x160] sm:$0xff] }
 0x1e6   :  { %v957_v38 = vmax.f32 %v1720_v43, 0.0  ;;  %v1714_v57 = vpack.c.bf16 %v1005_v56, %v1004_v55 }
 0x1e7   :  { %v958_v36 = vmax.f32 %v1722_v35, 0.0 }
 0x1e9   :  { %1079 = vmatprep.mubr.f32.mxu1 %v958_v36 }
 0x1ea   :  { %1080 = vmatmul.mubr.f32.vlgmr.msra.gmra.mrb[10].mxu1 %v957_v38 }
 0x1eb   :  { %1697 = vmatpush3.bf16.msra.mxu1 %v1696_v37  ;;  %1365 = vmatprep.mubr.msk.f32.mxu1 %vm1842_vm1, %v1840_v0  ;;  %v1002_v0 = vld [vmem:[#allocation6 + $0x150] sm:$0xff] }
 0x1ec   :  { %1698 = vmatprep.subr.bf16.mxu1 %v1841_v45  ;;  %v1711_v54 = vpack.c.bf16 %v1003_v53, %v1002_v0 }
 0x1ef   :  { %1700 = vmatpush3.bf16.msra.mxu1 %v1699_v41 }
 0x1f0   :  { %1701 = vmatprep.subr.bf16.mxu1 %v1841_v45 }
 0x1f3   :  { %1703 = vmatpush3.bf16.msra.mxu1 %v1702_v46 }
 0x1f4   :  { %1704 = vmatprep.subr.bf16.mxu1 %v1841_v45 }
 0x1f7   :  { %1706 = vmatpush3.bf16.msra.mxu1 %v1705_v49 }
 0x1f8   :  { %1707 = vmatprep.subr.bf16.mxu1 %v1841_v45 }
 0x1fb   :  { %1709 = vmatpush3.bf16.msra.mxu1 %v1708_v52 }
 0x1fc   :  { %1710 = vmatprep.subr.bf16.mxu1 %v1841_v45 }
 0x1ff   :  { %1712 = vmatpush3.bf16.msra.mxu1 %v1711_v54 }
 0x200   :  { %1713 = vmatprep.subr.bf16.mxu1 %v1841_v45 }
 0x203   :  { %1715 = vmatpush3.bf16.msra.mxu1 %v1714_v57 }
 0x204   :  { %1716 = vmatprep.subr.bf16.mxu1 %v1841_v45 }
 0x207   :  { %1718 = vmatpush3.bf16.msra.mxu1 %v1717_v60 }
 0x20a   :  { %1366 = vmatmul.mubr.f32.vlgmr.msra.gmra.mrb[12].mxu1 %v959_v62 }
 0x2bd   :  { %v1306_v63 = vpop.f32.mrb[10].mxu1 }
 0x2be   :  { %v1307_v1 = vpop.f32.mrb[11].mxu1 }
 0x2bf   :  { %v1308_v2 = vadd.f32 %v1307_v1, %v1306_v63 }
 0x2c1   :  { %v1082_v4 = vadd.f32 %v1308_v2, %v1165_v3 }
 0x2dd   :  { %v1151_v61 = vpop.f32.mrb[12].mxu1 }
 0x2de   :  { %v1152_v5 = vadd.f32 %v1151_v61, %v1082_v4  ;;  %v1367_v6 = vpop.f32.mrb[13].mxu1 }
 0x2e0   :  { %1155 = vst [vmem:[%s1989_s5] sm:$0xff] %v1152_v5 }
 0x2e1   :  { %1160 = vsyncpa [#allocation3], 1 }
 0x2e2   :  { %1161 = vsyncpa [#allocation5], 1 }
 0x2e3   :  { %1162 = vsyncpa [#allocation8], 1 }

</bundles_post_ra>
